<compile_context>
chip_gen: v7x
topology: tpu7x:2x2x1
jax: 0.10.0
libtpu: 0.0.40
codegen_flags: <defaults>
</compile_context>

<pallas_src>
import functools

import jax
import jax.numpy as jnp
from jax.experimental import pallas as pl
from jax.experimental.pallas import tpu as pltpu


def _round_up(v, m):
    return ((v + m - 1) // m) * m


def _mlp_kernel(x_ref, w1_ref, b1_ref, w2_ref, b2_ref, w3_ref, b3_ref, o_ref):
    # Fused 3-layer MLP: matmul (MXU) + bias + ReLU (VPU), f32 accumulation.
    x = x_ref[...]

    h1 = jnp.dot(x, w1_ref[...], preferred_element_type=jnp.float32) + b1_ref[...]
    h1 = jnp.maximum(h1, 0.0)

    h2 = (
        jnp.dot(h1.astype(w2_ref.dtype), w2_ref[...], preferred_element_type=jnp.float32)
        + b2_ref[...]
    )
    h2 = jnp.maximum(h2, 0.0)

    out = (
        jnp.dot(h2.astype(w3_ref.dtype), w3_ref[...], preferred_element_type=jnp.float32)
        + b3_ref[...]
    )
    o_ref[...] = out.astype(o_ref.dtype)


@functools.partial(jax.jit, static_argnames=("compute_dtype",))
def simple_nn_forward(x, params, *, compute_dtype=jnp.float32):
    """Fused SimpleNN forward pass.

    x:      (batch, input_dim) float32
    params: dict with w1 (in,64), b1 (1,64), w2 (64,32), b2 (1,32),
            w3 (32,out), b3 (1,out)   -- all float32
    compute_dtype: jnp.float32 (exact) or jnp.bfloat16 (halved HBM traffic for
            x / weights; accumulation stays f32).
    """
    w1, b1 = params["w1"], params["b1"]
    w2, b2 = params["w2"], params["b2"]
    w3, b3 = params["w3"], params["b3"]

    batch, in_dim = x.shape
    h1_dim = w1.shape[1]
    h2_dim = w2.shape[1]
    out_dim = w3.shape[1]

    # ---- batch tiling -------------------------------------------------------
    # TB=512: big enough to amortize per-step overhead, small enough that the
    # double-buffered x/out tiles + f32 intermediates stay far under v7x's
    # 64 MiB VMEM (and the 32 MiB scoped default) for any reasonable in_dim.
    TB = min(512, _round_up(batch, 8))
    b_pad = _round_up(batch, TB)
    n_tiles = b_pad // TB

    # ---- lane-dense output padding -----------------------------------------
    n_out_pad = _round_up(out_dim, 128)

    # ---- wrapper-side casts / padding (layout plumbing, not compute) -------
    xc = x.astype(compute_dtype)
    if b_pad != batch:
        xc = jnp.pad(xc, ((0, b_pad - batch), (0, 0)))
    w1c = w1.astype(compute_dtype)
    w2c = w2.astype(compute_dtype)
    w3c = jnp.pad(w3, ((0, 0), (0, n_out_pad - out_dim))).astype(compute_dtype)
    b3p = jnp.pad(b3, ((0, 0), (0, n_out_pad - out_dim)))  # biases stay f32

    # Weights/biases: full-array blocks with a constant index_map -> resident
    # in VMEM across all grid steps.
    resident = lambda a: pl.BlockSpec(a.shape, lambda i: (0,) * a.ndim)

    flops = 2 * b_pad * (in_dim * h1_dim + h1_dim * h2_dim + h2_dim * n_out_pad)
    bytes_accessed = (
        xc.size * xc.dtype.itemsize
        + w1c.size * w1c.dtype.itemsize
        + w2c.size * w2c.dtype.itemsize
        + w3c.size * w3c.dtype.itemsize
        + b1.size * 4 + b2.size * 4 + b3p.size * 4
        + b_pad * n_out_pad * 4
    )

    out_padded = pl.pallas_call(
        _mlp_kernel,
        out_shape=jax.ShapeDtypeStruct((b_pad, n_out_pad), jnp.float32),
        grid=(n_tiles,),
        in_specs=[
            pl.BlockSpec((TB, in_dim), lambda i: (i, 0)),  # x: streamed per step
            resident(w1c),
            resident(b1),
            resident(w2c),
            resident(b2),
            resident(w3c),
            resident(b3p),
        ],
        out_specs=pl.BlockSpec((TB, n_out_pad), lambda i: (i, 0)),
        compiler_params=pltpu.CompilerParams(
            dimension_semantics=("parallel",),  # megacore-shard the batch axis (v7x)
        ),
        cost_estimate=pl.CostEstimate(
            flops=flops, transcendentals=0, bytes_accessed=bytes_accessed
        ),
    )(xc, w1c, b1, w2c, b2, w3c, b3p)

    # Strip batch padding and the 128-lane output padding.
    return out_padded[:batch, :out_dim]


# ---------------------------------------------------------------------------
# Parameter init (matches torch: xavier_uniform_ weights, zero biases)
# ---------------------------------------------------------------------------
def xavier_uniform(key, fan_in, fan_out):
    bound = (6.0 / (fan_in + fan_out)) ** 0.5
    return jax.random.uniform(
        key, (fan_in, fan_out), dtype=jnp.float32, minval=-bound, maxval=bound
    )


def init_params(key, input_dim, output_dim):
    k1, k2, k3 = jax.random.split(key, 3)
    return {
        "w1": xavier_uniform(k1, input_dim, 64),
        "b1": jnp.zeros((1, 64), jnp.float32),
        "w2": xavier_uniform(k2, 64, 32),
        "b2": jnp.zeros((1, 32), jnp.float32),
        "w3": xavier_uniform(k3, 32, output_dim),
        "b3": jnp.zeros((1, output_dim), jnp.float32),
    }


def reference_forward(x, p):
    h1 = jnp.maximum(x @ p["w1"] + p["b1"], 0.0)
    h2 = jnp.maximum(h1 @ p["w2"] + p["b2"], 0.0)
    return h2 @ p["w3"] + p["b3"]


if __name__ == "__main__":
    key = jax.random.PRNGKey(0)
    k_x, k_p = jax.random.split(key)

    batch, input_dim, output_dim = 8, 32, 4
    x = jax.random.normal(k_x, (batch, input_dim), dtype=jnp.float32)
    params = init_params(k_p, input_dim, output_dim)

    # Exact f32 path (matches PyTorch semantics bit-for-bit up to matmul order).
    out = simple_nn_forward(x, params, compute_dtype=jnp.float32)
    out = jax.block_until_ready(out)

    ref = reference_forward(x, params)
    assert out.shape == (batch, output_dim)
    assert jnp.allclose(out, ref, atol=1e-5, rtol=1e-5)

    # bf16-traffic variant (perf path): just check it runs and is sane.
    out_bf16 = simple_nn_forward(x, params, compute_dtype=jnp.bfloat16)
    out_bf16 = jax.block_until_ready(out_bf16)
    assert out_bf16.shape == (batch, output_dim)
    assert bool(jnp.all(jnp.isfinite(out_bf16)))

    print("KERNEL_OK")
</pallas_src>

<mosaic_0001>
module attributes {stable_mosaic.version = 11 : i64} {
  func.func @_mlp_kernel(%arg0: i32, %arg1: memref<8x32xf32, #tpu.memory_space<vmem>>, %arg2: memref<32x64xf32, #tpu.memory_space<vmem>>, %arg3: memref<1x64xf32, #tpu.memory_space<vmem>>, %arg4: memref<64x32xf32, #tpu.memory_space<vmem>>, %arg5: memref<1x32xf32, #tpu.memory_space<vmem>>, %arg6: memref<32x128xf32, #tpu.memory_space<vmem>>, %arg7: memref<1x128xf32, #tpu.memory_space<vmem>>, %arg8: memref<8x128xf32, #tpu.memory_space<vmem>>) attributes {dimension_semantics = [#tpu.dimension_semantics<parallel>], iteration_bounds = array<i64: 1>, scalar_prefetch = 0 : i64, scratch_operands = 0 : i64, tpu.core_type = #tpu.core_type<tc>, window_params = [{transform_indices = @transform_0, window_bounds = array<i64: 8, 32>}, {pipeline_mode = #tpu.pipeline_mode<synchronous>, transform_indices = @transform_1, window_bounds = array<i64: 32, 64>}, {pipeline_mode = #tpu.pipeline_mode<synchronous>, transform_indices = @transform_2, window_bounds = array<i64: 1, 64>}, {pipeline_mode = #tpu.pipeline_mode<synchronous>, transform_indices = @transform_3, window_bounds = array<i64: 64, 32>}, {pipeline_mode = #tpu.pipeline_mode<synchronous>, transform_indices = @transform_4, window_bounds = array<i64: 1, 32>}, {pipeline_mode = #tpu.pipeline_mode<synchronous>, transform_indices = @transform_5, window_bounds = array<i64: 32, 128>}, {pipeline_mode = #tpu.pipeline_mode<synchronous>, transform_indices = @transform_6, window_bounds = array<i64: 1, 128>}, {transform_indices = @transform_7, window_bounds = array<i64: 8, 128>}]} {
    %c0 = arith.constant 0 : index
    %c0_0 = arith.constant 0 : index
    %0 = vector.load %arg1[%c0, %c0_0] : memref<8x32xf32, #tpu.memory_space<vmem>>, vector<8x32xf32>
    %c0_1 = arith.constant 0 : index
    %c0_2 = arith.constant 0 : index
    %1 = vector.load %arg2[%c0_1, %c0_2] : memref<32x64xf32, #tpu.memory_space<vmem>>, vector<32x64xf32>
    %cst = arith.constant dense<0.000000e+00> : vector<8x64xf32>
    %2 = tpu.matmul %0, %1, %cst {dimension_numbers = #tpu.dot_dimension_numbers<[1], [0], [0], [1], [0, 0, 1, 1], [], []>} : vector<8x32xf32>, vector<32x64xf32>, vector<8x64xf32> -> vector<8x64xf32>
    %c0_3 = arith.constant 0 : index
    %c0_4 = arith.constant 0 : index
    %3 = vector.load %arg3[%c0_3, %c0_4] : memref<1x64xf32, #tpu.memory_space<vmem>>, vector<1x64xf32>
    %4 = vector.broadcast %3 : vector<1x64xf32> to vector<8x64xf32>
    %5 = arith.addf %2, %4 : vector<8x64xf32>
    %cst_5 = arith.constant 0.000000e+00 : f32
    %6 = vector.broadcast %cst_5 : f32 to vector<8x64xf32>
    %7 = arith.maximumf %5, %6 : vector<8x64xf32>
    %c0_6 = arith.constant 0 : index
    %c0_7 = arith.constant 0 : index
    %8 = vector.load %arg4[%c0_6, %c0_7] : memref<64x32xf32, #tpu.memory_space<vmem>>, vector<64x32xf32>
    %cst_8 = arith.constant dense<0.000000e+00> : vector<8x32xf32>
    %9 = tpu.matmul %7, %8, %cst_8 {dimension_numbers = #tpu.dot_dimension_numbers<[1], [0], [0], [1], [0, 0, 1, 1], [], []>} : vector<8x64xf32>, vector<64x32xf32>, vector<8x32xf32> -> vector<8x32xf32>
    %c0_9 = arith.constant 0 : index
    %c0_10 = arith.constant 0 : index
    %10 = vector.load %arg5[%c0_9, %c0_10] : memref<1x32xf32, #tpu.memory_space<vmem>>, vector<1x32xf32>
    %11 = vector.broadcast %10 : vector<1x32xf32> to vector<8x32xf32>
    %12 = arith.addf %9, %11 : vector<8x32xf32>
    %cst_11 = arith.constant 0.000000e+00 : f32
    %13 = vector.broadcast %cst_11 : f32 to vector<8x32xf32>
    %14 = arith.maximumf %12, %13 : vector<8x32xf32>
    %c0_12 = arith.constant 0 : index
    %c0_13 = arith.constant 0 : index
    %15 = vector.load %arg6[%c0_12, %c0_13] : memref<32x128xf32, #tpu.memory_space<vmem>>, vector<32x128xf32>
    %cst_14 = arith.constant dense<0.000000e+00> : vector<8x128xf32>
    %16 = tpu.matmul %14, %15, %cst_14 {dimension_numbers = #tpu.dot_dimension_numbers<[1], [0], [0], [1], [0, 0, 1, 1], [], []>} : vector<8x32xf32>, vector<32x128xf32>, vector<8x128xf32> -> vector<8x128xf32>
    %c0_15 = arith.constant 0 : index
    %c0_16 = arith.constant 0 : index
    %17 = vector.load %arg7[%c0_15, %c0_16] : memref<1x128xf32, #tpu.memory_space<vmem>>, vector<1x128xf32>
    %18 = vector.broadcast %17 : vector<1x128xf32> to vector<8x128xf32>
    %19 = arith.addf %16, %18 : vector<8x128xf32>
    %c0_17 = arith.constant 0 : index
    %c0_18 = arith.constant 0 : index
    %20 = vector.load %arg8[%c0_17, %c0_18] : memref<8x128xf32, #tpu.memory_space<vmem>>, vector<8x128xf32>
    tpu.vector_store %arg8[%c0_17, %c0_18], %19 {strides = array<i32>} : memref<8x128xf32, #tpu.memory_space<vmem>>, vector<8x128xf32>,
    return
  }
  func.func @transform_0(%arg0: i32) -> (i32, i32) {
    %c0_i32 = arith.constant 0 : i32
    %c0_i32_0 = arith.constant 0 : i32
    return %arg0, %c0_i32 : i32, i32
  }
  func.func @transform_1(%arg0: i32) -> (i32, i32) {
    %c0_i32 = arith.constant 0 : i32
    %c0_i32_0 = arith.constant 0 : i32
    %c0_i32_1 = arith.constant 0 : i32
    return %c0_i32, %c0_i32_0 : i32, i32
  }
  func.func @transform_2(%arg0: i32) -> (i32, i32) {
    %c0_i32 = arith.constant 0 : i32
    %c0_i32_0 = arith.constant 0 : i32
    %c0_i32_1 = arith.constant 0 : i32
    return %c0_i32, %c0_i32_0 : i32, i32
  }
  func.func @transform_3(%arg0: i32) -> (i32, i32) {
    %c0_i32 = arith.constant 0 : i32
    %c0_i32_0 = arith.constant 0 : i32
    %c0_i32_1 = arith.constant 0 : i32
    return %c0_i32, %c0_i32_0 : i32, i32
  }
  func.func @transform_4(%arg0: i32) -> (i32, i32) {
    %c0_i32 = arith.constant 0 : i32
    %c0_i32_0 = arith.constant 0 : i32
    %c0_i32_1 = arith.constant 0 : i32
    return %c0_i32, %c0_i32_0 : i32, i32
  }
  func.func @transform_5(%arg0: i32) -> (i32, i32) {
    %c0_i32 = arith.constant 0 : i32
    %c0_i32_0 = arith.constant 0 : i32
    %c0_i32_1 = arith.constant 0 : i32
    return %c0_i32, %c0_i32_0 : i32, i32
  }
  func.func @transform_6(%arg0: i32) -> (i32, i32) {
    %c0_i32 = arith.constant 0 : i32
    %c0_i32_0 = arith.constant 0 : i32
    %c0_i32_1 = arith.constant 0 : i32
    return %c0_i32, %c0_i32_0 : i32, i32
  }
  func.func @transform_7(%arg0: i32) -> (i32, i32) {
    %c0_i32 = arith.constant 0 : i32
    %c0_i32_0 = arith.constant 0 : i32
    return %arg0, %c0_i32 : i32, i32
  }
}

</mosaic_0001>

<bundles_post_ra>
// kernel: simple_nn_forward.1
= control target key start
LH: loop header
LB: loop body
LE: loop exit
PB: predicated region body
PF: predicated region fallthrough
CT: control target
= control target key end

     0   :  { %v385_v0 = vmov 0.0|0.0   ;;  %vm386_vm0 = vmmov 0   ;;  %v387_v4 = vmov 0.0   ;;  %vm38_vm1 = vcmask 261120   ;;  %s496_s1 = inlined_call_operand.vmem [shape: f32[32,64], index: 1, kind: input, shape index: {}]   ;;  %s497_s3 = inlined_call_operand.vmem [shape: f32[64,32], index: 3, kind: input, shape index: {}]   ;;  %s498_s0 = inlined_call_operand.vmem [shape: f32[8,32], index: 0, kind: input, shape index: {}]   ;;  %s499_s5 = inlined_call_operand.vmem [shape: f32[32,128], index: 5, kind: input, shape index: {}]   ;;  %s500_s2 = inlined_call_operand.vmem [shape: f32[1,64], index: 2, kind: input, shape index: {}]   ;;  %s501_s4 = inlined_call_operand.vmem [shape: f32[1,32], index: 4, kind: input, shape index: {}]   ;;  %s502_s6 = inlined_call_operand.vmem [shape: f32[1,128], index: 6, kind: input, shape index: {}]   ;;  %s503_s7 = inlined_call_operand.vmem [shape: f32[8,128], index: 7, kind: output, shape index: {}]  }
   0x1   :  { %358 = vmatprep.subr.bf16.mxu0 %v385_v0  ;;  %v27_v1 = vld [vmem:[%s496_s1] sm:$0xff]  ;;  %v28_v2 = vld [vmem:[%s496_s1 + $0x8] sm:$0xff]  ;;  %v29_v3 = vld [vmem:[%s496_s1 + $0x10] sm:$0xff]  ;;  %325 = vmatprep.mubr.msk.f32.mxu0 %vm386_vm0, %v387_v4  ;;  %vm128_vm2 = vcmask 523264  }
   0x2   :  { %v359_v5 = vpack.c.bf16 %v28_v2, %v27_v1  ;;  %v30_v6 = vld [vmem:[%s496_s1 + $0x18] sm:$0xff]  ;;  %364 = vmatprep.subr.bf16.mxu1 %v385_v0  ;;  %v113_v7 = vld [vmem:[%s497_s3] sm:$0xff]  ;;  %344 = vmatprep.mubr.msk.f32.mxu1 %vm386_vm0, %v387_v4  ;;  %v114_v8 = vld [vmem:[%s497_s3 + $0x8] sm:$0xff] }
   0x3   :  { %v115_v9 = vld [vmem:[%s497_s3 + $0x10] sm:$0xff]  ;;  %v116_v10 = vld [vmem:[%s497_s3 + $0x18] sm:$0xff]  ;;  %v362_v11 = vpack.c.bf16 %v30_v6, %v29_v3  ;;  %v365_v12 = vpack.c.bf16 %v114_v8, %v113_v7  ;;  %v117_v14 = vld [vmem:[%s497_s3 + $0x20] sm:$0xff] }
   0x4   :  { %360 = vmatpush3.bf16.msra.mxu0 %v359_v5  ;;  %v368_v13 = vpack.c.bf16 %v116_v10, %v115_v9  ;;  %v118_v15 = vld [vmem:[%s497_s3 + $0x28] sm:$0xff]  ;;  %v26_v16 = vld [vmem:[%s498_s0] sm:$0xff]  ;;  %v119_v18 = vld [vmem:[%s497_s3 + $0x30] sm:$0xff] }
   0x5   :  { %361 = vmatprep.subr.bf16.mxu0 %v385_v0  ;;  %366 = vmatpush3.bf16.msra.mxu1 %v365_v12  ;;  %v371_v17 = vpack.c.bf16 %v118_v15, %v117_v14  ;;  %v120_v19 = vld [vmem:[%s497_s3 + $0x38] sm:$0xff]  ;;  %v203_v21 = vld [vmem:[%s499_s5] sm:$0xff]  ;;  %v204_v22 = vld [vmem:[%s499_s5 + $0x8] sm:$0xff] }
   0x6   :  { %367 = vmatprep.subr.bf16.mxu1 %v385_v0  ;;  %v374_v20 = vpack.c.bf16 %v120_v19, %v119_v18  ;;  %v377_v23 = vpack.c.bf16 %v204_v22, %v203_v21  ;;  %v292_v24 = vld [vmem:[%s500_s2] ss:$0 sm:$0xff]  ;;  %v205_v29 = vld [vmem:[%s499_s5 + $0x10] sm:$0xff]  ;;  %v206_v30 = vld [vmem:[%s499_s5 + $0x18] sm:$0xff] }
   0x7   :  { %v380_v31 = vpack.c.bf16 %v206_v30, %v205_v29  ;;  %v294_v32 = vld [vmem:[%s501_s4] ss:$0 sm:$0xff] }
   0x8   :  { %363 = vmatpush3.bf16.msra.mxu0 %v362_v11  ;;  %v296_v37 = vld [vmem:[%s502_s6] ss:$0 sm:$0xff] }
   0x9   :  { %376 = vmatprep.subr.bf16.mxu0 %v385_v0  ;;  %369 = vmatpush3.bf16.msra.mxu1 %v368_v13 }
   0xa   :  { %370 = vmatprep.subr.bf16.mxu1 %v385_v0 }
   0xb   :  { %326 = vmatmul.mubr.msk.f32.vlgmr.msra.gmra.mrb[0].mxu0 %vm38_vm1, %v26_v16 }
   0xc   :  { %355 = vmatprep.mubr.msk.f32.mxu0 %vm386_vm0, %v387_v4  ;;  %378 = vmatpush3.bf16.msra.mxu0 %v377_v23 }
   0xd   :  { %372 = vmatpush3.bf16.msra.mxu1 %v371_v17  ;;  %379 = vmatprep.subr.bf16.mxu0 %v385_v0 }
   0xe   :  { %373 = vmatprep.subr.bf16.mxu1 %v385_v0 }
  0x10   :  { %381 = vmatpush3.bf16.msra.mxu0 %v380_v31 }
  0x11   :  { %375 = vmatpush3.bf16.msra.mxu1 %v374_v20 }
  0xde   :  { %v108_v25 = vpop.f32.mrb[0].mxu0 }
  0xdf   :  { %v109_v26 = vadd.f32 %v292_v24, %v108_v25  ;;  %v327_v27 = vpop.f32.mrb[1].mxu0 }
  0xe1   :  { %v112_v28 = vmax.f32 %v109_v26, 0.0 }
  0xe3   :  { %345 = vmatmul.mubr.msk.f32.vlgmr.msra.gmra.mrb[0].mxu1 %vm128_vm2, %v112_v28 }
 0x1b6   :  { %v198_v33 = vpop.f32.mrb[0].mxu1 }
 0x1b7   :  { %v199_v34 = vadd.f32 %v294_v32, %v198_v33  ;;  %v346_v35 = vpop.f32.mrb[1].mxu1 }
 0x1b9   :  { %v202_v36 = vmax.f32 %v199_v34, 0.0 }
 0x1bb   :  { %356 = vmatmul.mubr.msk.f32.vlgmr.msra.gmra.mrb[2].mxu0 %vm38_vm1, %v202_v36 }
 0x28e   :  { %v283_v38 = vpop.f32.mrb[2].mxu0 }
 0x28f   :  { %v284_v39 = vadd.f32 %v296_v37, %v283_v38  ;;  %v357_v40 = vpop.f32.mrb[3].mxu0 }
 0x291   :  { %287 = vst [vmem:[%s503_s7] sm:$0xff] %v284_v39 }

</bundles_post_ra>
